<compile_context>
chip_gen: v7x
topology: tpu7x:2x2x1
jax: 0.10.0
libtpu: 0.0.40
codegen_flags: <defaults>
</compile_context>

<pallas_src>
import jax
import jax.numpy as jnp
from jax.experimental import pallas as pl
from jax.experimental.pallas import tpu as pltpu


# ----------------------------- helpers ---------------------------------------

def _pick_q_tile(n, target=256):
    """Largest query-tile <= target that divides n and is a multiple of 8.

    Falls back to the full query length: the key/context axis is never tiled
    here (softmax is whole-row), and query padding would need masked writes.
    """
    if n <= target:
        return n
    t = (target // 8) * 8
    while t >= 8:
        if n % t == 0:
            return t
        t -= 8
    return n


# ----------------------------- fused kernel -----------------------------------

def _make_fused_attention_kernel(scale, heads, dim_head, compute_dtype):
    inner = heads * dim_head

    def kernel(x_ref, ctx_ref, wq_ref, wkv_ref, wo_ref, bo_ref, o_ref):
        cd = compute_dtype
        xq = x_ref[0].astype(cd)                      # (tq, Dq)
        xc = ctx_ref[0].astype(cd)                    # (M,  Dc)

        # --- projections (MXU, bf16 operands, f32 accumulation) --------------
        # softmax scale folded into q (tq*inner muls instead of tq*M later)
        q = jnp.dot(xq, wq_ref[...].astype(cd),
                    preferred_element_type=jnp.float32) * scale       # (tq, inner)
        kv = jnp.dot(xc, wkv_ref[...].astype(cd),
                     preferred_element_type=jnp.float32)               # (M, 2*inner)
        # split at a 128-lane boundary: vreg-aligned, free
        k = kv[:, :inner]
        v = kv[:, inner:]

        tq = q.shape[0]
        mc = k.shape[0]

        # --- head-batched attention ------------------------------------------
        # one relayout per operand to (H, rows, dh); then the per-head matmuls
        # become single batched contractions (batch dim = H)
        qh = q.reshape(tq, heads, dim_head).transpose(1, 0, 2).astype(cd)  # (H,tq,dh)
        kh = k.reshape(mc, heads, dim_head).transpose(1, 0, 2).astype(cd)  # (H,M,dh)
        vh = v.reshape(mc, heads, dim_head).transpose(1, 0, 2).astype(cd)  # (H,M,dh)

        sim = jnp.einsum("hnd,hmd->hnm", qh, kh,
                         preferred_element_type=jnp.float32)               # (H,tq,M)
        m = jnp.max(sim, axis=-1, keepdims=True)
        p = jnp.exp(sim - m)
        l = jnp.sum(p, axis=-1, keepdims=True)

        pv = jnp.einsum("hnm,hmd->hnd", p.astype(cd), vh,
                        preferred_element_type=jnp.float32)                # (H,tq,dh)
        # normalise AFTER the PV matmul (tq*dh muls per head, not tq*M);
        # EUP approximate reciprocal stays off the VALU critical path.
        oh = pv * pl.reciprocal(l, approx=True)

        # back to lane-dense (tq, inner) once, then the fused output projection
        attn_out = oh.transpose(1, 0, 2).reshape(tq, inner)                # (tq,inner)
        y = jnp.dot(attn_out.astype(cd), wo_ref[...].astype(cd),
                    preferred_element_type=jnp.float32) + bo_ref[...]      # (tq,out)

        # single dense store per grid step (whole block written at once)
        o_ref[0] = y.astype(o_ref.dtype)

    return kernel


# ----------------------------- wrapper -----------------------------------------

def attention_forward(x, params, context=None, compute_dtype=jnp.bfloat16):
    """Pallas equivalent of Attention.forward(x, context=None, mask=None)."""
    wq, wkv, wo, bo = params["wq"], params["wkv"], params["wo"], params["bo"]
    heads, dim_head = params["heads"], params["dim_head"]
    scale = dim_head ** (-0.5)
    inner = heads * dim_head

    ctx = x if context is None else context
    B, N, Dq = x.shape
    _, M, Dc = ctx.shape
    out_dim = wo.shape[1]

    tq = _pick_q_tile(N)
    grid = (B, N // tq)

    itemsize = jnp.dtype(x.dtype).itemsize
    cost = pl.CostEstimate(
        flops=(2 * B * N * Dq * inner            # q projection
               + 4 * B * M * Dc * inner          # fused kv projection
               + 4 * B * heads * N * M * dim_head  # QK^T + PV
               + 2 * B * N * inner * out_dim),   # output projection
        transcendentals=B * heads * N * M,       # exp
        bytes_accessed=((B * N * Dq + B * M * Dc + B * N * out_dim) * itemsize
                        + (Dq * inner + Dc * 2 * inner
                           + inner * out_dim + out_dim) * 4),
    )

    kernel = _make_fused_attention_kernel(scale, heads, dim_head, compute_dtype)

    # NOTE: at larger tiles/sequence lengths raise the scoped VMEM limit via
    # pltpu.CompilerParams(vmem_limit_bytes=...); unnecessary at these sizes.
    return pl.pallas_call(
        kernel,
        out_shape=jax.ShapeDtypeStruct((B, N, out_dim), x.dtype),
        grid=grid,
        in_specs=[
            pl.BlockSpec((1, tq, Dq), lambda b, i: (b, i, 0)),     # queries
            pl.BlockSpec((1, M, Dc), lambda b, i: (b, 0, 0)),      # context (full M)
            pl.BlockSpec((Dq, inner), lambda b, i: (0, 0)),        # wq   (resident)
            pl.BlockSpec((Dc, 2 * inner), lambda b, i: (0, 0)),    # wkv  (resident)
            pl.BlockSpec((inner, out_dim), lambda b, i: (0, 0)),   # wo   (resident)
            pl.BlockSpec((1, out_dim), lambda b, i: (0, 0)),       # bo   (resident)
        ],
        out_specs=pl.BlockSpec((1, tq, out_dim), lambda b, i: (b, i, 0)),
        compiler_params=pltpu.CompilerParams(
            dimension_semantics=("parallel", "parallel")),
        cost_estimate=cost,
    )(x, ctx, wq, wkv, wo, bo.reshape(1, out_dim))


# ----------------------------- reference (pure JAX, f32) -----------------------

def attention_reference(x, params, context=None):
    wq, wkv, wo, bo = params["wq"], params["wkv"], params["wo"], params["bo"]
    heads, dim_head = params["heads"], params["dim_head"]
    scale = dim_head ** (-0.5)
    inner = heads * dim_head
    ctx = x if context is None else context
    B, N, _ = x.shape
    M = ctx.shape[1]
    q = x @ wq
    kv = ctx @ wkv
    k, v = kv[..., :inner], kv[..., inner:]

    def sh(t, s):
        return t.reshape(B, s, heads, dim_head).transpose(0, 2, 1, 3)

    qh, kh, vh = sh(q, N), sh(k, M), sh(v, M)
    sim = jnp.einsum("bhid,bhjd->bhij", qh, kh) * scale
    attn = jax.nn.softmax(sim, axis=-1)
    out = jnp.einsum("bhij,bhjd->bhid", attn, vh)
    out = out.transpose(0, 2, 1, 3).reshape(B, N, inner)
    return out @ wo + bo


# ----------------------------- main --------------------------------------------

if __name__ == "__main__":
    # small synthetic config; heads*dim_head = 128 -> lane-dense activations
    batch, seq, query_dim = 2, 8, 32
    heads, dim_head = 8, 16
    inner_dim = heads * dim_head
    context_dim = query_dim          # default(context_dim, query_dim)
    ctx_len = 16                     # cross-attention context length (!= seq)

    key = jax.random.PRNGKey(0)
    kx, kc, kq, kkv, ko, kb = jax.random.split(key, 6)

    x = jax.random.normal(kx, (batch, seq, query_dim), dtype=jnp.float32)
    ctx = jax.random.normal(kc, (batch, ctx_len, context_dim), dtype=jnp.float32)

    # parameters stored pre-transposed as (in_features, out_features)
    params = dict(
        wq=jax.random.normal(kq, (query_dim, inner_dim), jnp.float32) * 0.1,
        wkv=jax.random.normal(kkv, (context_dim, 2 * inner_dim), jnp.float32) * 0.1,
        wo=jax.random.normal(ko, (inner_dim, query_dim), jnp.float32) * 0.1,
        bo=jax.random.normal(kb, (query_dim,), jnp.float32) * 0.1,
        heads=heads,
        dim_head=dim_head,
    )

    # Tolerance vs. the f32 reference reflects bf16 matmul operands (per the
    # performance review) + the EUP approximate reciprocal in the softmax.
    ATOL = RTOL = 3e-2

    # self-attention (context=None)
    y = attention_forward(x, params)
    jax.block_until_ready(y)
    y_ref = attention_reference(x, params)
    assert y.shape == (batch, seq, query_dim)
    assert jnp.allclose(y, y_ref, atol=ATOL, rtol=RTOL), "self-attention mismatch"

    # cross-attention (context length != query length)
    y2 = attention_forward(x, params, context=ctx)
    jax.block_until_ready(y2)
    y2_ref = attention_reference(x, params, context=ctx)
    assert y2.shape == (batch, seq, query_dim)
    assert jnp.allclose(y2, y2_ref, atol=ATOL, rtol=RTOL), "cross-attention mismatch"

    print("KERNEL_OK")
</pallas_src>

<mosaic_0001>
module attributes {stable_mosaic.version = 11 : i64} {
  func.func @kernel(%arg0: i32, %arg1: i32, %arg2: memref<1x8x32xf32, #tpu.memory_space<vmem>>, %arg3: memref<1x8x32xf32, #tpu.memory_space<vmem>>, %arg4: memref<32x128xf32, #tpu.memory_space<vmem>>, %arg5: memref<32x256xf32, #tpu.memory_space<vmem>>, %arg6: memref<128x32xf32, #tpu.memory_space<vmem>>, %arg7: memref<1x32xf32, #tpu.memory_space<vmem>>, %arg8: memref<1x8x32xf32, #tpu.memory_space<vmem>>) attributes {dimension_semantics = [#tpu.dimension_semantics<parallel>, #tpu.dimension_semantics<parallel>], iteration_bounds = array<i64: 2, 1>, scalar_prefetch = 0 : i64, scratch_operands = 0 : i64, tpu.core_type = #tpu.core_type<tc>, window_params = [{transform_indices = @transform_0, window_bounds = array<i64: 1, 8, 32>}, {transform_indices = @transform_1, window_bounds = array<i64: 1, 8, 32>}, {pipeline_mode = #tpu.pipeline_mode<synchronous>, transform_indices = @transform_2, window_bounds = array<i64: 32, 128>}, {pipeline_mode = #tpu.pipeline_mode<synchronous>, transform_indices = @transform_3, window_bounds = array<i64: 32, 256>}, {pipeline_mode = #tpu.pipeline_mode<synchronous>, transform_indices = @transform_4, window_bounds = array<i64: 128, 32>}, {pipeline_mode = #tpu.pipeline_mode<synchronous>, transform_indices = @transform_5, window_bounds = array<i64: 1, 32>}, {transform_indices = @transform_6, window_bounds = array<i64: 1, 8, 32>}]} {
    %c0 = arith.constant 0 : index
    %c0_0 = arith.constant 0 : index
    %c0_1 = arith.constant 0 : index
    %0 = vector.load %arg2[%c0, %c0_0, %c0_1] : memref<1x8x32xf32, #tpu.memory_space<vmem>>, vector<1x8x32xf32>
    %1 = vector.shape_cast %0 : vector<1x8x32xf32> to vector<8x32xf32>
    %2 = arith.truncf %1 : vector<8x32xf32> to vector<8x32xbf16>
    %c0_2 = arith.constant 0 : index
    %c0_3 = arith.constant 0 : index
    %c0_4 = arith.constant 0 : index
    %3 = vector.load %arg3[%c0_2, %c0_3, %c0_4] : memref<1x8x32xf32, #tpu.memory_space<vmem>>, vector<1x8x32xf32>
    %4 = vector.shape_cast %3 : vector<1x8x32xf32> to vector<8x32xf32>
    %5 = arith.truncf %4 : vector<8x32xf32> to vector<8x32xbf16>
    %c0_5 = arith.constant 0 : index
    %c0_6 = arith.constant 0 : index
    %6 = vector.load %arg4[%c0_5, %c0_6] : memref<32x128xf32, #tpu.memory_space<vmem>>, vector<32x128xf32>
    %7 = arith.truncf %6 : vector<32x128xf32> to vector<32x128xbf16>
    %cst = arith.constant dense<0.000000e+00> : vector<8x128xf32>
    %8 = tpu.matmul %2, %7, %cst {dimension_numbers = #tpu.dot_dimension_numbers<[1], [0], [0], [1], [0, 0, 1, 1], [], []>} : vector<8x32xbf16>, vector<32x128xbf16>, vector<8x128xf32> -> vector<8x128xf32>
    %cst_7 = arith.constant 2.500000e-01 : f32
    %9 = vector.broadcast %cst_7 : f32 to vector<8x128xf32>
    %10 = arith.mulf %8, %9 : vector<8x128xf32>
    %c0_8 = arith.constant 0 : index
    %c0_9 = arith.constant 0 : index
    %11 = vector.load %arg5[%c0_8, %c0_9] : memref<32x256xf32, #tpu.memory_space<vmem>>, vector<32x256xf32>
    %12 = arith.truncf %11 : vector<32x256xf32> to vector<32x256xbf16>
    %cst_10 = arith.constant dense<0.000000e+00> : vector<8x256xf32>
    %13 = tpu.matmul %5, %12, %cst_10 {dimension_numbers = #tpu.dot_dimension_numbers<[1], [0], [0], [1], [0, 0, 1, 1], [], []>} : vector<8x32xbf16>, vector<32x256xbf16>, vector<8x256xf32> -> vector<8x256xf32>
    %14 = vector.extract_strided_slice %13 {offsets = [0, 0], sizes = [8, 128], strides = [1, 1]} : vector<8x256xf32> to vector<8x128xf32>
    %15 = vector.extract_strided_slice %13 {offsets = [0, 128], sizes = [8, 128], strides = [1, 1]} : vector<8x256xf32> to vector<8x128xf32>
    %16 = vector.shape_cast %10 : vector<8x128xf32> to vector<8x8x16xf32>
    %17 = tpu.transpose %16, [1, 0, 2] : vector<8x8x16xf32> -> vector<8x8x16xf32>
    %18 = arith.truncf %17 : vector<8x8x16xf32> to vector<8x8x16xbf16>
    %19 = vector.shape_cast %14 : vector<8x128xf32> to vector<8x8x16xf32>
    %20 = tpu.transpose %19, [1, 0, 2] : vector<8x8x16xf32> -> vector<8x8x16xf32>
    %21 = arith.truncf %20 : vector<8x8x16xf32> to vector<8x8x16xbf16>
    %22 = vector.shape_cast %15 : vector<8x128xf32> to vector<8x8x16xf32>
    %23 = tpu.transpose %22, [1, 0, 2] : vector<8x8x16xf32> -> vector<8x8x16xf32>
    %24 = arith.truncf %23 : vector<8x8x16xf32> to vector<8x8x16xbf16>
    "tpu.trace_start"() <{level = 10 : i32, message = "hnd,hmd->hnm"}> : () -> ()
    %cst_11 = arith.constant dense<0.000000e+00> : vector<8x8x8xf32>
    %25 = tpu.matmul %18, %21, %cst_11 {dimension_numbers = #tpu.dot_dimension_numbers<[2], [2], [1], [1], [0, 0, 0, 1, 1, 1], [0], [0]>} : vector<8x8x16xbf16>, vector<8x8x16xbf16>, vector<8x8x8xf32> -> vector<8x8x8xf32>
    "tpu.trace_stop"() : () -> ()
    %cst_12 = arith.constant dense<0xFF800000> : vector<8x8xf32>
    %26 = vector.multi_reduction <maximumf>, %25, %cst_12 [2] : vector<8x8x8xf32> to vector<8x8xf32>
    %27 = vector.shape_cast %26 : vector<8x8xf32> to vector<8x8x1xf32>
    %28 = vector.broadcast %27 : vector<8x8x1xf32> to vector<8x8x8xf32>
    %29 = arith.subf %25, %28 : vector<8x8x8xf32>
    %30 = math.exp %29 : vector<8x8x8xf32>
    %cst_13 = arith.constant dense<0.000000e+00> : vector<8x8xf32>
    %31 = vector.multi_reduction <add>, %30, %cst_13 [2] : vector<8x8x8xf32> to vector<8x8xf32>
    %32 = vector.shape_cast %31 : vector<8x8xf32> to vector<8x8x1xf32>
    %33 = arith.truncf %30 : vector<8x8x8xf32> to vector<8x8x8xbf16>
    "tpu.trace_start"() <{level = 10 : i32, message = "hnm,hmd->hnd"}> : () -> ()
    %cst_14 = arith.constant dense<0.000000e+00> : vector<8x8x16xf32>
    %34 = tpu.matmul %33, %24, %cst_14 {dimension_numbers = #tpu.dot_dimension_numbers<[2], [1], [1], [2], [0, 0, 0, 1, 1, 2], [0], [0]>} : vector<8x8x8xbf16>, vector<8x8x16xbf16>, vector<8x8x16xf32> -> vector<8x8x16xf32>
    "tpu.trace_stop"() : () -> ()
    %35 = tpu.reciprocal %32 {approx = true} : vector<8x8x1xf32> -> vector<8x8x1xf32>
    %36 = vector.broadcast %35 : vector<8x8x1xf32> to vector<8x8x16xf32>
    %37 = arith.mulf %34, %36 : vector<8x8x16xf32>
    %38 = tpu.transpose %37, [1, 0, 2] : vector<8x8x16xf32> -> vector<8x8x16xf32>
    %39 = vector.shape_cast %38 : vector<8x8x16xf32> to vector<8x128xf32>
    %40 = arith.truncf %39 : vector<8x128xf32> to vector<8x128xbf16>
    %c0_15 = arith.constant 0 : index
    %c0_16 = arith.constant 0 : index
    %41 = vector.load %arg6[%c0_15, %c0_16] : memref<128x32xf32, #tpu.memory_space<vmem>>, vector<128x32xf32>
    %42 = arith.truncf %41 : vector<128x32xf32> to vector<128x32xbf16>
    %cst_17 = arith.constant dense<0.000000e+00> : vector<8x32xf32>
    %43 = tpu.matmul %40, %42, %cst_17 {dimension_numbers = #tpu.dot_dimension_numbers<[1], [0], [0], [1], [0, 0, 1, 1], [], []>} : vector<8x128xbf16>, vector<128x32xbf16>, vector<8x32xf32> -> vector<8x32xf32>
    %c0_18 = arith.constant 0 : index
    %c0_19 = arith.constant 0 : index
    %44 = vector.load %arg7[%c0_18, %c0_19] : memref<1x32xf32, #tpu.memory_space<vmem>>, vector<1x32xf32>
    %45 = vector.broadcast %44 : vector<1x32xf32> to vector<8x32xf32>
    %46 = arith.addf %43, %45 : vector<8x32xf32>
    %c0_20 = arith.constant 0 : index
    %c0_21 = arith.constant 0 : index
    %c0_22 = arith.constant 0 : index
    %47 = vector.load %arg8[%c0_20, %c0_21, %c0_22] : memref<1x8x32xf32, #tpu.memory_space<vmem>>, vector<1x8x32xf32>
    %48 = vector.shape_cast %47 : vector<1x8x32xf32> to vector<8x32xf32>
    %49 = vector.shape_cast %46 : vector<8x32xf32> to vector<1x8x32xf32>
    tpu.vector_store %arg8[%c0_20, %c0_21, %c0_22], %49 {strides = array<i32>} : memref<1x8x32xf32, #tpu.memory_space<vmem>>, vector<1x8x32xf32>,
    return
  }
  func.func @transform_0(%arg0: i32, %arg1: i32) -> (i32, i32, i32) {
    %c0_i32 = arith.constant 0 : i32
    %c0_i32_0 = arith.constant 0 : i32
    return %arg0, %arg1, %c0_i32 : i32, i32, i32
  }
  func.func @transform_1(%arg0: i32, %arg1: i32) -> (i32, i32, i32) {
    %c0_i32 = arith.constant 0 : i32
    %c0_i32_0 = arith.constant 0 : i32
    %c0_i32_1 = arith.constant 0 : i32
    return %arg0, %c0_i32, %c0_i32_0 : i32, i32, i32
  }
  func.func @transform_2(%arg0: i32, %arg1: i32) -> (i32, i32) {
    %c0_i32 = arith.constant 0 : i32
    %c0_i32_0 = arith.constant 0 : i32
    %c0_i32_1 = arith.constant 0 : i32
    return %c0_i32, %c0_i32_0 : i32, i32
  }
  func.func @transform_3(%arg0: i32, %arg1: i32) -> (i32, i32) {
    %c0_i32 = arith.constant 0 : i32
    %c0_i32_0 = arith.constant 0 : i32
    %c0_i32_1 = arith.constant 0 : i32
    return %c0_i32, %c0_i32_0 : i32, i32
  }
  func.func @transform_4(%arg0: i32, %arg1: i32) -> (i32, i32) {
    %c0_i32 = arith.constant 0 : i32
    %c0_i32_0 = arith.constant 0 : i32
    %c0_i32_1 = arith.constant 0 : i32
    return %c0_i32, %c0_i32_0 : i32, i32
  }
  func.func @transform_5(%arg0: i32, %arg1: i32) -> (i32, i32) {
    %c0_i32 = arith.constant 0 : i32
    %c0_i32_0 = arith.constant 0 : i32
    %c0_i32_1 = arith.constant 0 : i32
    return %c0_i32, %c0_i32_0 : i32, i32
  }
  func.func @transform_6(%arg0: i32, %arg1: i32) -> (i32, i32, i32) {
    %c0_i32 = arith.constant 0 : i32
    %c0_i32_0 = arith.constant 0 : i32
    return %arg0, %arg1, %c0_i32 : i32, i32, i32
  }
}

</mosaic_0001>

<bundles_post_ra>
// kernel: tpu_custom_call.1
= control target key start
LH: loop header
LB: loop body
LE: loop exit
PB: predicated region body
PF: predicated region fallthrough
CT: control target
= control target key end

     0   :  { %11 = vsyncpa [#allocation3], 0  ;;  %s3687_s0 = inlined_call_operand.vmem [shape: f32[2,8,32], index: 0, kind: input, shape index: {}]   ;;  %s3688_s1 = inlined_call_operand.vmem [shape: f32[2,8,32], index: 1, kind: input, shape index: {}]   ;;  %s3689_s2 = inlined_call_operand.vmem [shape: f32[32,128], index: 2, kind: input, shape index: {}]   ;;  %s3690_s3 = inlined_call_operand.vmem [shape: f32[32,256], index: 3, kind: input, shape index: {}]   ;;  %s3691_s4 = inlined_call_operand.vmem [shape: f32[128,32], index: 4, kind: input, shape index: {}]   ;;  %s3692_s5 = inlined_call_operand.vmem [shape: f32[1,32], index: 5, kind: input, shape index: {}]   ;;  %s3693_s6 = inlined_call_operand.hbm [shape: f32[2,8,32], index: 6, kind: output, shape index: {}]  }
   0x1   :  { %13 = vsyncpa [#allocation3 + $0x1], 0  ;;  %s3083_s21 = smov 0   ;;  %s3085_s22 = smov 0  }
   0x2   :  { %s3087_s23 = smov 0   ;;  %s3089_s24 = smov 0  }
   0x3   :  { %s3091_s25 = smov 0   ;;  %s3093_s26 = smov 0  }
   0x4 LB: > { %s2625_s27 = sadd.s32 4294967295, %s3033_s26   ;;  %s2626_s28 = sadd.s32 4294967294, %s3033_s26   ;;  %s3033_s26 = sphi %s3093_s26, %s19_s26   ;;  %s3029_s25 = sphi %s3091_s25, %s3700_s25   ;;  %s3025_s24 = sphi %s3089_s24, %s3699_s24   ;;  %s3021_s23 = sphi %s3087_s23, %s3698_s23   ;;  %s3017_s22 = sphi %s3085_s22, %s3697_s22   ;;  %s3013_s21 = sphi %s3083_s21, %s3696_s21  }
   0x5   : > { %s31_s29 = sadd.s32 1, %s3029_s25  ;;  %s178_s30 = sadd.s32 1, %s3021_s23 }
   0x6   : > { %p33_p0 = scmp.ge.s32.totalorder %s31_s29, 2  ;;  %p188_p1 = scmp.ne.s32.totalorder %s3021_s23, %s3017_s22 }
   0x7   : > { %p189_p2 = scmp.eq.s32.totalorder %s2625_s27, 1  ;;  %p194_p3 = scmp.ne.s32.totalorder %s3017_s22, %s3013_s21 }
   0x8   : > { %s3702_s29 = smov (%p33_p0, %s31_s29), 0  ;;  %p195_p5 = scmp.eq.s32.totalorder %s2626_s28, 1 }
   0x9   : > { %p3123_p4 = por %p189_p2, %p188_p1  ;;  %s173_s8 = ssub.s32 %s3029_s25, %s3702_s29 }
   0xa   : > { %p2629_p6 = scmp.ge.s32.totalorder %s3033_s26, 1  ;;  %p176_p7 = scmp.eq.s32.totalorder %s173_s8, 0 }
   0xb   : > { %p3130_p8 = por %p195_p5, %p194_p3  ;;  %p242_p9 = scmp.lt.s32.totalorder %s3033_s26, 3 }
   0xc   : > { %s3136_s10 = scalar_select %p176_p7, %s3021_s23, %s178_s30  }
   0xd   : > { %p243_p10 = pnand %p2629_p6, %p242_p9 }
   0xe   : > { %v294_v0 = vld [vmem:[%s3689_s2] sm:$0xff] (!%p243_p10)  ;;  %v295_v1 = vld [vmem:[%s3689_s2 + $0x8] sm:$0xff] (!%p243_p10)  ;;  %v296_v2 = vld [vmem:[%s3689_s2 + $0x10] sm:$0xff] (!%p243_p10)  ;;  %p278_p11 = scmp.lt.s32.totalorder (!%p243_p10), %s3025_s24, 1  ;;  %v3035_v3 = vmov (!%p243_p10), 0.0   ;;  %vm3036_vm0 = vmmov (!%p243_p10), 0   ;;  %v428_v35 = vlaneseq (!%p243_p10) }
   0xf   : > { %246 = sbr.rel (%p243_p10) target bundleno = 1438 (0x59e), region = 44  ;;  %2732 = vmatprep.subr.bf16.mxu1 (!%p243_p10), %v3035_v3  ;;  %v298_v4 = vpack.c.bf16 (!%p243_p10), %v295_v1, %v294_v0  ;;  %v297_v5 = vld [vmem:[%s3689_s2 + $0x18] sm:$0xff] (!%p243_p10)  ;;  %2736 = vmatprep.mubr.msk.bf16.mxu1 (!%p243_p10), %vm3036_vm0, %v3035_v3  ;;  %v346_v6 = vld [vmem:[%s3690_s3 + $0x8] sm:$0xff] (!%p243_p10)  ;;  %v345_v10 = vld [vmem:[%s3690_s3] sm:$0xff] (!%p243_p10)  ;;  %vm300_vm1 = vcmask (!%p243_p10), 261120   ;;  %v3037_v22 = vmov (!%p243_p10), 0  }
  0x10   : > { %v348_v7 = vld [vmem:[%s3690_s3 + $0x18] sm:$0xff] (!%p243_p10)  ;;  %2752 = vmatprep.subr.bf16.mxu0 (!%p243_p10), %v3035_v3  ;;  %2754 = vmatprep.mubr.msk.bf16.mxu0 (!%p243_p10), %vm3036_vm0, %v3035_v3  ;;  %v299_v8 = vpack.c.bf16 (!%p243_p10), %v297_v5, %v296_v2  ;;  %v347_v11 = vld [vmem:[%s3690_s3 + $0x10] sm:$0xff] (!%p243_p10)  ;;  %v350_v12 = vld [vmem:[%s3690_s3 + $0x28] sm:$0xff] (!%p243_p10)  ;;  %s3039_s16 = smov (!%p243_p10), 112   ;;  %s3041_s18 = smov (!%p243_p10), 48   ;;  %v429_v39 = vshrl.u32 (!%p243_p10), %v428_v35, 7 }
  0x11   : > { %2733 = vmatpush3.bf16.msra.mxu1 (!%p243_p10), %v298_v4  ;;  %v354_v9 = vpack.c.bf16 (!%p243_p10), %v348_v7, %v346_v6  ;;  %v352_v13 = vld [vmem:[%s3690_s3 + $0x38] sm:$0xff] (!%p243_p10)  ;;  %v353_v16 = vpack.c.bf16 (!%p243_p10), %v347_v11, %v345_v10  ;;  %v349_v18 = vld [vmem:[%s3690_s3 + $0x20] sm:$0xff] (!%p243_p10)  ;;  %v351_v19 = vld [vmem:[%s3690_s3 + $0x30] sm:$0xff] (!%p243_p10)  ;;  %s3042_s19 = smov (!%p243_p10), 64   ;;  %s3043_s20 = smov (!%p243_p10), 16   ;;  %vm1307_vm2 = vcmask (!%p243_p10), 130048  }
  0x12   : > { %2734 = vmatprep.subr.bf16.mxu1 (!%p243_p10), %v3035_v3  ;;  %v356_v17 = vpack.c.bf16 (!%p243_p10), %v352_v13, %v350_v12  ;;  %v355_v21 = vpack.c.bf16 (!%p243_p10), %v351_v19, %v349_v18  ;;  %s3044_s27 = smov (!%p243_p10), 32   ;;  %v3045_v33 = vmov (!%p243_p10), 1983009808   ;;  %v3046_v36 = vmov (!%p243_p10), 1934713408   ;;  %s2685_s15 = sshll.u32 (!%p243_p10), %s3025_s24, 7 }
  0x13   : > { %v426_v34 = vunpack.c.l.s4 (!%p243_p10), %v3045_v33  ;;  %v490_v37 = vunpack.c.l.s4 (!%p243_p10), %v3046_v36  ;;  %vm1760_vm3 = vcmask (!%p243_p10), 1043456   ;;  %vm1676_vm4 = vcmask (!%p243_p10), 64512   ;;  %s3047_s12 = smov (!%p243_p10), [#allocation2]  }
  0x14   : > { %vm2444_vm5 = vcmask (!%p243_p10), 392192   ;;  %vm2446_vm6 = vcmask (!%p243_p10), 523264   ;;  %vm2448_vm7 = vcmask (!%p243_p10), 654336   ;;  %vm2450_vm8 = vcmask (!%p243_p10), 785408   ;;  %s2959_s13 = sshll.u32 (!%p243_p10), %s3047_s12, 4  ;;  %s2960_s13 = int_to_ptr.vmem [resolvable:$false] %s2959_s13 }
  0x15   : > { %2735 = vmatpush3.bf16.msra.mxu1 (!%p243_p10), %v299_v8  ;;  %v427_v38 = vunpack.c.0.s8 (!%p243_p10), %v426_v34  ;;  %v491_v42 = vunpack.c.0.s8 (!%p243_p10), %v490_v37  ;;  %vm2452_vm9 = vcmask (!%p243_p10), 916480   ;;  %s2961_s14 = scalar_lea.vmem (!%p243_p10), %s2960_s13, 256 }
  0x16   : > { %s279_s30 = scalar_select %p278_p11, %s3025_s24, 1  ;;  %360 = vmatprep.subr.bf16.mxu1 %v354_v9 }
  0x17   : > { %v3229_v43 = vsub.s32 %v427_v38, %v429_v39  ;;  %v3231_v50 = vsub.s32 %v491_v42, %v429_v39 }
  0x18   : > { %s2631_s8 = sshll.u32 %s279_s30, 3 }
  0x19   : > { %s284_s17 = scalar_lea.vmem %s3687_s0, %s2631_s8  ;;  %s288_s11 = scalar_lea.vmem %s3688_s1, %s2631_s8 }
  0x1a   : > { %v290_v14 = vld [vmem:[%s284_s17] sm:$0xff]  ;;  %s3038_s8 = smov 80   ;;  %s3040_s17 = smov 96  }
  0x1b   : > { %v291_v15 = vpack.c.bf16 %v290_v14, %v290_v14  ;;  %v292_v20 = vld [vmem:[%s288_s11] sm:$0xff] }
  0x1c   : > { %v293_v23 = vpack.c.bf16 %v292_v20, %v292_v20 }
  0x1d   : > { %2737 = vmatmul.mubr.msk.bf16.vlgmr.msra.gmra.mrb[0].mxu1 %vm300_vm1, %v291_v15 }
  0x1e   : > { %361 = vmatpush1.bf16.msra.mxu1 %v353_v16  ;;  %392 = vmatprep.mubr.bf16.mxu1 %v3037_v22 }
  0x1f   : > { %362 = vmatprep.subr.bf16.mxu1 %v356_v17 }
  0x22   : > { %363 = vmatpush1.bf16.msra.mxu1 %v355_v21 }
  0x23   : > { %2740 = vmatprep.subr.bf16.mxu1 %v3035_v3 }
  0x25   : > { %2634 = vmatmul.mubr.msk.bf16.vlgmr.msra.gmra.mrb[4].mxu1 %vm300_vm1, %v293_v23 }
  0x26   : > { %2742 = vmatprep.mubr.msk.bf16.mxu1 %vm3036_vm0, %v3035_v3 }
  0xf0   : > { %v338_v24 = vpop.f32.mrb[0].mxu1 }
  0xf1   : > { %v2738_v25 = vpop.f32.mrb[1].mxu1  ;;  %v3198_v31 = vmul.f32 0.25, %v338_v24 }
  0xf2   : > { %v341_v26 = vpop.f32.mrb[2].mxu1 }
  0xf3   : > { %v2739_v27 = vpop.f32.mrb[3].mxu1 }
  0xf8   : > { %v394_v28 = vpop.f32.mrb[4].mxu1 }
  0xf9   : > { %710 = vrot.lane.b32.xlu1 %v394_v28, %s3038_s8  ;;  %704 = vrot.lane.b32.xlu0 %v394_v28, %s3039_s16  ;;  %v3196_v29 = vpop.f32.mrb[5].mxu1 }
  0xfa   : > { %v398_v30 = vpop.f32.mrb[6].mxu1 }
  0xfb   : > { %v399_v32 = vpop.f32.mrb[7].mxu1 }
  0xfd   : > { %402 = vrot.lane.b32.xlu1 %v3198_v31, %s3039_s16  ;;  %707 = vrot.lane.b32.xlu0 %v394_v28, %s3040_s17 }
 0x101   : > { %408 = vrot.lane.b32.xlu1 %v3198_v31, %s3038_s8  ;;  %405 = vrot.lane.b32.xlu0 %v3198_v31, %s3040_s17 }
 0x105   : > { %716 = vrot.lane.b32.xlu1 %v394_v28, %s3041_s18  ;;  %713 = vrot.lane.b32.xlu0 %v394_v28, %s3042_s19 }
 0x109   : > { %722 = vrot.lane.b32.xlu1 %v394_v28, %s3043_s20  ;;  %719 = vrot.lane.b32.xlu0 %v394_v28, %s3044_s27 }
 0x10d   : > { %414 = vrot.lane.b32.xlu1 %v3198_v31, %s3041_s18  ;;  %411 = vrot.lane.b32.xlu0 %v3198_v31, %s3042_s19 }
 0x111   : > { %420 = vrot.lane.b32.xlu1 %v3198_v31, %s3043_s20  ;;  %417 = vrot.lane.b32.xlu0 %v3198_v31, %s3044_s27 }
 0x115   : > { %1009 = vrot.lane.b32.xlu1 %v3196_v29, %s3040_s17  ;;  %1006 = vrot.lane.b32.xlu0 %v3196_v29, %s3039_s16 }
 0x119   : > { %1018 = vrot.lane.b32.xlu1 %v3196_v29, %s3041_s18  ;;  %1012 = vrot.lane.b32.xlu0 %v3196_v29, %s3038_s8 }
 0x11d   : > { %1015 = vrot.lane.b32.xlu0 %v3196_v29, %s3042_s19 }
 0x16b   : > { %v711_v40 = vpop.permute.xlu1 %710  ;;  %v705_v41 = vpop.permute.xlu0 %704 }
 0x16c   : > { %v741_v44 = vcombine.low %v705_v41, %v711_v40  ;;  %v742_v45 = vcombine.high %v705_v41, %v711_v40 }
 0x16e   : > { %v749_v51 = vrot.slane %v741_v44, %v3229_v43  ;;  %v756_v52 = vrot.slane %v742_v45, %v3229_v43 }
 0x16f   : > { %v403_v46 = vpop.permute.xlu1 %402  ;;  %v708_v47 = vpop.permute.xlu0 %707 }
 0x170   : > { %v725_v48 = vcombine.low %v394_v28, %v708_v47  ;;  %v726_v49 = vcombine.high %v394_v28, %v708_v47 }
 0x172   : > { %v733_v53 = vrot.slane %v725_v48, %v3229_v43  ;;  %v740_v54 = vrot.slane %v726_v49, %v3229_v43 }
 0x173   : > { %v409_v55 = vpop.permute.xlu1 %408  ;;  %v406_v56 = vpop.permute.xlu0 %405 }
 0x174   : > { %v789_v57 = vcombine.low %v733_v53, %v749_v51  ;;  %v790_v58 = vcombine.high %v733_v53, %v749_v51  ;;  %v805_v59 = vcombine.low %v740_v54, %v756_v52  ;;  %v806_v60 = vcombine.high %v740_v54, %v756_v52 }
 0x175   : > { %v439_v61 = vcombine.low %v403_v46, %v409_v55  ;;  %v440_v62 = vcombine.high %v403_v46, %v409_v55  ;;  %v423_v63 = vcombine.low %v3198_v31, %v406_v56  ;;  %v424_v0 = vcombine.high %v3198_v31, %v406_v56 }
 0x176   : > { %v797_v1 = vrot.slane %v789_v57, %v3231_v50  ;;  %v804_v2 = vrot.slane %v790_v58, %v3231_v50  ;;  %v813_v4 = vrot.slane %v805_v59, %v3231_v50  ;;  %v820_v5 = vrot.slane %v806_v60, %v3231_v50 }
 0x177   : > { %v447_v6 = vrot.slane %v439_v61, %v3229_v43  ;;  %v454_v7 = vrot.slane %v440_v62, %v3229_v43  ;;  %v431_v8 = vrot.slane %v423_v63, %v3229_v43  ;;  %v438_v9 = vrot.slane %v424_v0, %v3229_v43  ;;  %v717_v10 = vpop.permute.xlu1 %716  ;;  %v714_v11 = vpop.permute.xlu0 %713 }
 0x178   : > { %v2643_v12 = vcombine.low %v797_v1, %v804_v2  ;;  %v2645_v13 = vcombine.high %v797_v1, %v804_v2  ;;  %v2647_v14 = vcombine.low %v813_v4, %v820_v5  ;;  %v2649_v15 = vcombine.high %v813_v4, %v820_v5 }
 0x179   : > { %v487_v16 = vcombine.low %v431_v8, %v447_v6  ;;  %v488_v17 = vcombine.high %v431_v8, %v447_v6  ;;  %v503_v18 = vcombine.low %v438_v9, %v454_v7  ;;  %v504_v19 = vcombine.high %v438_v9, %v454_v7 }
 0x17a   : > { %v869_v20 = vrot.slane %v2643_v12, %v3229_v43  ;;  %v885_v21 = vrot.slane %v2645_v13, %v3229_v43  ;;  %v901_v22 = vrot.slane %v2647_v14, %v3229_v43  ;;  %v917_v23 = vrot.slane %v2649_v15, %v3229_v43 }
 0x17b   : > { %v495_v24 = vrot.slane %v487_v16, %v3231_v50  ;;  %v502_v25 = vrot.slane %v488_v17, %v3231_v50  ;;  %v511_v26 = vrot.slane %v503_v18, %v3231_v50  ;;  %v518_v27 = vrot.slane %v504_v19, %v3231_v50  ;;  %v723_v28 = vpop.permute.xlu1 %722  ;;  %v720_v30 = vpop.permute.xlu0 %719 }
 0x17c   : > { %v773_v31 = vcombine.low %v717_v10, %v723_v28  ;;  %v774_v32 = vcombine.high %v717_v10, %v723_v28  ;;  %v757_v33 = vcombine.low %v714_v11, %v720_v30  ;;  %v758_v34 = vcombine.high %v714_v11, %v720_v30 }
 0x17d   : > { %v2635_v35 = vcombine.low %v495_v24, %v502_v25  ;;  %v2637_v36 = vcombine.high %v495_v24, %v502_v25  ;;  %v2639_v37 = vcombine.low %v511_v26, %v518_v27  ;;  %v2641_v38 = vcombine.high %v511_v26, %v518_v27 }
 0x17e   : > { %v781_v39 = vrot.slane %v773_v31, %v3229_v43  ;;  %v788_v40 = vrot.slane %v774_v32, %v3229_v43  ;;  %v765_v41 = vrot.slane %v757_v33, %v3229_v43  ;;  %v772_v42 = vrot.slane %v758_v34, %v3229_v43 }
 0x17f   : > { %v415_v44 = vpop.permute.xlu1 %414  ;;  %v412_v45 = vpop.permute.xlu0 %411  ;;  %v3260_v51 = vrot.slane %v2635_v35, %v3229_v43  ;;  %v3263_v52 = vrot.slane %v2637_v36, %v3229_v43  ;;  %v925_v53 = vcombine.low %v869_v20, %v885_v21  ;;  %v957_v54 = vcombine.low %v901_v22, %v917_v23 }
 0x180   : > { %v821_v46 = vcombine.low %v765_v41, %v781_v39  ;;  %v822_v47 = vcombine.high %v765_v41, %v781_v39  ;;  %v837_v48 = vcombine.low %v772_v42, %v788_v40  ;;  %v838_v49 = vcombine.high %v772_v42, %v788_v40 }
 0x181   : > { %v3266_v55 = vrot.slane %v2639_v37, %v3229_v43  ;;  %v3269_v56 = vrot.slane %v2641_v38, %v3229_v43  ;;  %v3280_v63 = vrot.slane %v925_v53, %v3231_v50  ;;  %v3283_v0 = vrot.slane %v957_v54, %v3231_v50 }
 0x182   : > { %v829_v57 = vrot.slane %v821_v46, %v3231_v50  ;;  %v836_v58 = vrot.slane %v822_v47, %v3231_v50  ;;  %v3274_v59 = vrot.slane %v837_v48, %v3231_v50  ;;  %v3277_v60 = vrot.slane %v838_v49, %v3231_v50 }
 0x183   : > { %v421_v61 = vpop.permute.xlu1 %420  ;;  %v418_v62 = vpop.permute.xlu0 %417  ;;  %v926_v1 = vcombine.high %v869_v20, %v885_v21  ;;  %v958_v2 = vcombine.high %v901_v22, %v917_v23  ;;  %v623_v8 = vcombine.low %v3260_v51, %v3263_v52  ;;  %v655_v9 = vcombine.low %v3266_v55, %v3269_v56 }
 0x184   : > { %v471_v4 = vcombine.low %v415_v44, %v421_v61  ;;  %v472_v5 = vcombine.high %v415_v44, %v421_v61  ;;  %v455_v6 = vcombine.low %v412_v45, %v418_v62  ;;  %v456_v7 = vcombine.high %v412_v45, %v418_v62 }
 0x185   : > { %v2644_v10 = vcombine.low %v829_v57, %v836_v58  ;;  %v2646_v11 = vcombine.high %v829_v57, %v836_v58  ;;  %v2648_v18 = vcombine.low %v3274_v59, %v3277_v60  ;;  %v989_v19 = vcombine.low %v3280_v63, %v3283_v0 }
 0x186   : > { %v479_v12 = vrot.slane %v471_v4, %v3229_v43  ;;  %v486_v13 = vrot.slane %v472_v5, %v3229_v43  ;;  %v463_v14 = vrot.slane %v455_v6, %v3229_v43  ;;  %v470_v15 = vrot.slane %v456_v7, %v3229_v43 }
 0x187   : > { %v1010_v16 = vpop.permute.xlu1 %1009  ;;  %v1007_v17 = vpop.permute.xlu0 %1006  ;;  %v3298_v20 = vrot.slane %v926_v1, %v3231_v50  ;;  %v3301_v21 = vrot.slane %v958_v2, %v3231_v50  ;;  %v997_v26 = vpack.c.bf16 %v989_v19, %v989_v19  ;;  %v2650_v36 = vcombine.high %v3274_v59, %v3277_v60 }
 0x188   : > { %v519_v22 = vcombine.low %v463_v14, %v479_v12  ;;  %v520_v23 = vcombine.high %v463_v14, %v479_v12  ;;  %v535_v24 = vcombine.low %v470_v15, %v486_v13  ;;  %v536_v25 = vcombine.high %v470_v15, %v486_v13 }
 0x189   : > { %v991_v27 = vcombine.low %v3298_v20, %v3301_v21  ;;  %v1027_v28 = vcombine.low %v3196_v29, %v1010_v16  ;;  %v1028_v30 = vcombine.high %v3196_v29, %v1010_v16  ;;  %v1312_v37 = vsel %vm1307_vm2, %v997_v26, 0 }
 0x18a   : > { %v527_v31 = vrot.slane %v519_v22, %v3231_v50  ;;  %v534_v32 = vrot.slane %v520_v23, %v3231_v50  ;;  %v543_v33 = vrot.slane %v535_v24, %v3231_v50  ;;  %v550_v34 = vrot.slane %v536_v25, %v3231_v50  ;;  %2741 = vmatpush3.bf16.xpose.msra.mxu1 %v1312_v37 }
 0x18b   : > { %v1013_v35 = vpop.permute.xlu0 %1012  ;;  %v999_v38 = vpack.c.bf16 %v991_v27, %v991_v27  ;;  %v3315_v40 = vrot.slane %v2644_v10, %v3229_v43  ;;  %v3318_v41 = vrot.slane %v2646_v11, %v3229_v43  ;;  %v1035_v46 = vrot.slane %v1027_v28, %v3229_v43  ;;  %2746 = vmatprep.subr.bf16.mxu1 %v3035_v3 }
 0x18c   : > { %v1043_v39 = vcombine.low %v1007_v17, %v1013_v35  ;;  %v2636_v42 = vcombine.low %v527_v31, %v534_v32  ;;  %v2638_v44 = vcombine.high %v527_v31, %v534_v32  ;;  %v1044_v47 = vcombine.high %v1007_v17, %v1013_v35 }
 0x18d   : > { %v1404_v45 = vsel %vm1307_vm2, %v999_v38, 0  ;;  %v2640_v49 = vcombine.low %v543_v33, %v550_v34  ;;  %v2642_v53 = vcombine.high %v543_v33, %v550_v34  ;;  %v1042_v54 = vrot.slane %v1028_v30, %v3229_v43 }
 0x18e   : > { %v1051_v48 = vrot.slane %v1043_v39, %v3229_v43  ;;  %2753 = vmatpush3.bf16.xpose.msra.mxu0 %v1404_v45  ;;  %v631_v57 = vrot.slane %v623_v8, %v3231_v50  ;;  %v1058_v58 = vrot.slane %v1044_v47, %v3229_v43  ;;  %v663_v61 = vrot.slane %v655_v9, %v3231_v50 }
 0x18f   : > { %2764 = vmatprep.subr.bf16.mxu0 %v3035_v3  ;;  %v908_v62 = vrot.slane %v2648_v18, %v3229_v43  ;;  %v924_v1 = vrot.slane %v2650_v36, %v3229_v43  ;;  %v3332_v2 = vrot.slane %v2636_v42, %v3229_v43  ;;  %v3335_v4 = vrot.slane %v2638_v44, %v3229_v43 }
 0x190   : > { %v1091_v59 = vcombine.low %v1035_v46, %v1051_v48  ;;  %v1092_v60 = vcombine.high %v1035_v46, %v1051_v48  ;;  %v1107_v7 = vcombine.low %v1042_v54, %v1058_v58  ;;  %v1108_v8 = vcombine.high %v1042_v54, %v1058_v58 }
 0x191   : > { %v687_v10 = vcombine.low %v631_v57, %v663_v61  ;;  %v624_v9 = vcombine.high %v3260_v51, %v3263_v52  ;;  %v656_v11 = vcombine.high %v3266_v55, %v3269_v56  ;;  %v990_v12 = vcombine.high %v3280_v63, %v3283_v0 }
 0x192   : > { %v1099_v5 = vrot.slane %v1091_v59, %v3231_v50  ;;  %v1106_v6 = vrot.slane %v1092_v60, %v3231_v50  ;;  %v3346_v13 = vrot.slane %v2640_v49, %v3229_v43  ;;  %v3349_v14 = vrot.slane %v2642_v53, %v3229_v43 }
 0x193   : > { %v1115_v15 = vrot.slane %v1107_v7, %v3231_v50  ;;  %v1122_v16 = vrot.slane %v1108_v8, %v3231_v50  ;;  %v695_v17 = vpack.c.bf16 %v687_v10, %v687_v10  ;;  %v638_v18 = vrot.slane %v624_v9, %v3231_v50 }
 0x194   : > { %v670_v51 = vrot.slane %v656_v11, %v3231_v50  ;;  %v998_v52 = vpack.c.bf16 %v990_v12, %v990_v12  ;;  %v2651_v55 = vcombine.low %v1099_v5, %v1106_v6  ;;  %v2653_v56 = vcombine.high %v1099_v5, %v1106_v6 }
 0x195   : > { %v2655_v19 = vcombine.low %v1115_v15, %v1122_v16  ;;  %v2657_v63 = vcombine.high %v1115_v15, %v1122_v16  ;;  %2743 = vmatmul.mubr.msk.bf16.vlgmr.msra.gmra.mrb[8].mxu1 %vm1307_vm2, %v695_v17  ;;  %v941_v23 = vcombine.low %v3315_v40, %v3318_v41  ;;  %v639_v24 = vcombine.low %v3332_v2, %v3335_v4 }
 0x196   : > { %v689_v0 = vcombine.low %v638_v18, %v670_v51  ;;  %v1358_v22 = vsel %vm1307_vm2, %v998_v52, 0  ;;  %v671_v25 = vcombine.low %v3346_v13, %v3349_v14  ;;  %v973_v26 = vcombine.low %v908_v62, %v924_v1  ;;  %2748 = vmatprep.mubr.msk.bf16.mxu1 %vm3036_vm0, %v3035_v3 }
 0x197   : > { %2747 = vmatpush3.bf16.xpose.msra.mxu1 %v1358_v22  ;;  %v949_v28 = vrot.slane %v941_v23, %v3231_v50  ;;  %v688_v30 = vcombine.high %v631_v57, %v663_v61  ;;  %v992_v31 = vcombine.high %v3298_v20, %v3301_v21  ;;  %v1171_v32 = vrot.slane %v2651_v55, %v3229_v43 }
 0x198   : > { %v697_v27 = vpack.c.bf16 %v689_v0, %v689_v0  ;;  %2758 = vmatprep.subr.bf16.mxu1 %v3035_v3  ;;  %v1187_v33 = vrot.slane %v2653_v56, %v3229_v43  ;;  %v981_v34 = vrot.slane %v973_v26, %v3231_v50  ;;  %v942_v35 = vcombine.high %v3315_v40, %v3318_v41 }
 0x199   : > { %v1203_v36 = vrot.slane %v2655_v19, %v3229_v43  ;;  %v1219_v37 = vrot.slane %v2657_v63, %v3229_v43  ;;  %v1000_v38 = vpack.c.bf16 %v992_v31, %v992_v31  ;;  %v974_v39 = vcombine.high %v908_v62, %v924_v1 }
 0x19a   : > { %2755 = vmatmul.mubr.msk.bf16.vlgmr.msra.gmra.mrb[0].mxu0 %vm1307_vm2, %v697_v27  ;;  %v993_v42 = vcombine.low %v949_v28, %v981_v34  ;;  %v647_v20 = vrot.slane %v639_v24, %v3231_v50  ;;  %v679_v21 = vrot.slane %v671_v25, %v3231_v50  ;;  %v956_v44 = vrot.slane %v942_v35, %v3231_v50 }
 0x19b   : > { %2766 = vmatprep.mubr.msk.bf16.mxu0 %vm3036_vm0, %v3035_v3  ;;  %v696_v45 = vpack.c.bf16 %v688_v30, %v688_v30  ;;  %v988_v40 = vrot.slane %v974_v39, %v3231_v50  ;;  %v1227_v46 = vcombine.low %v1171_v32, %v1187_v33  ;;  %v1450_v47 = vsel %vm1307_vm2, %v1000_v38, 0 }
 0x19c   : > { %v1001_v41 = vpack.c.bf16 %v993_v42, %v993_v42  ;;  %v994_v48 = vcombine.high %v949_v28, %v981_v34  ;;  %v1259_v49 = vcombine.low %v1203_v36, %v1219_v37  ;;  %v691_v54 = vcombine.low %v647_v20, %v679_v21 }
 0x19d   : > { %v995_v57 = vcombine.low %v956_v44, %v988_v40  ;;  %v640_v58 = vcombine.high %v3332_v2, %v3335_v4  ;;  %v690_v59 = vcombine.high %v638_v18, %v670_v51  ;;  %v672_v60 = vcombine.high %v3346_v13, %v3349_v14 }
 0x19e   : > { %2749 = vmatmul.mubr.msk.bf16.vlgmr.msra.gmra.mrb[12].mxu1 %vm1307_vm2, %v696_v45  ;;  %v1496_v53 = vsel %vm1307_vm2, %v1001_v41, 0  ;;  %v1235_v61 = vrot.slane %v1227_v46, %v3231_v50  ;;  %v1267_v62 = vrot.slane %v1259_v49, %v3231_v50  ;;  %v1228_v1 = vcombine.high %v1171_v32, %v1187_v33 }
 0x19f   : > { %2759 = vmatpush3.bf16.xpose.msra.mxu1 %v1450_v47  ;;  %2760 = vmatprep.mubr.msk.bf16.mxu1 %vm3036_vm0, %v3035_v3  ;;  %v1002_v5 = vpack.c.bf16 %v994_v48, %v994_v48  ;;  %v1260_v6 = vcombine.high %v1203_v36, %v1219_v37  ;;  %v699_v7 = vpack.c.bf16 %v691_v54, %v691_v54 }
 0x1a0   : > { %2765 = vmatpush3.bf16.xpose.msra.mxu0 %v1496_v53  ;;  %2770 = vmatprep.subr.bf16.mxu1 %v3035_v3  ;;  %v1003_v8 = vpack.c.bf16 %v995_v57, %v995_v57  ;;  %v1242_v2 = vrot.slane %v1228_v1, %v3231_v50  ;;  %v698_v4 = vpack.c.bf16 %v690_v59, %v690_v59 }
 0x1a1   : > { %2776 = vmatprep.subr.bf16.mxu0 %v3035_v3  ;;  %v1274_v10 = vrot.slane %v1260_v6, %v3231_v50  ;;  %v654_v9 = vrot.slane %v640_v58, %v3231_v50  ;;  %v686_v11 = vrot.slane %v672_v60, %v3231_v50  ;;  %v1291_v12 = vcombine.low %v1235_v61, %v1267_v62 }
 0x1a2   : > { %v1542_v13 = vsel %vm1307_vm2, %v1002_v5, 0  ;;  %v996_v14 = vcombine.high %v956_v44, %v988_v40  ;;  %v1588_v17 = vsel %vm1307_vm2, %v1003_v8, 0  ;;  %v692_v18 = vcombine.high %v647_v20, %v679_v21 }
 0x1a3   : > { %v3402_v15 = vcombine.low %v1242_v2, %v1274_v10  ;;  %v3404_v16 = vcombine.high %v1242_v2, %v1274_v10  ;;  %v693_v51 = vcombine.low %v654_v9, %v686_v11  ;;  %v1299_v52 = vpack.c.bf16 %v1291_v12, %v1291_v12  ;;  %v1019_v12 = vpop.permute.xlu1 %1018 }
 0x1a4   : > { %v1004_v55 = vpack.c.bf16 %v996_v14, %v996_v14  ;;  %v700_v56 = vpack.c.bf16 %v692_v18, %v692_v18  ;;  %v1292_v22 = vcombine.high %v1235_v61, %v1267_v62  ;;  %v694_v23 = vcombine.high %v654_v9, %v686_v11  ;;  %v1016_v11 = vpop.permute.xlu0 %1015 }
 0x1a5   : > { %v701_v19 = vpack.c.bf16 %v693_v51, %v693_v51  ;;  %v1762_v63 = vsel %vm1760_vm3, %v1299_v52, 0 }
 0x1a6   : > { %2761 = vmatmul.mubr.msk.bf16.vlgmr.msra.gmra.mrb[16].mxu1 %vm1307_vm2, %v698_v4  ;;  %v1634_v0 = vsel %vm1307_vm2, %v1004_v55, 0  ;;  %v1300_v24 = vpack.c.bf16 %v1292_v22, %v1292_v22  ;;  %v702_v25 = vpack.c.bf16 %v694_v23, %v694_v23 }
 0x1a7   : > { %2767 = vmatmul.mubr.msk.bf16.vlgmr.msra.gmra.mrb[4].mxu0 %vm1307_vm2, %v699_v7  ;;  %2771 = vmatpush3.bf16.xpose.msra.mxu1 %v1542_v13 }
 0x1a8   : > { %2777 = vmatpush3.bf16.xpose.msra.mxu0 %v1588_v17  ;;  %2778 = vmatprep.mubr.msk.bf16.mxu0 %vm3036_vm0, %v3035_v3  ;;  %v1808_v26 = vsel %vm1760_vm3, %v1300_v24, 0 }
 0x1a9   : > { %2788 = vmatprep.subr.bf16.mxu0 %v3035_v3  ;;  %2772 = vmatprep.mubr.msk.bf16.mxu1 %vm3036_vm0, %v3035_v3 }
 0x1aa   : > { %2782 = vmatprep.subr.bf16.mxu1 %v3035_v3 }
 0x1ae   : > { %2773 = vmatmul.mubr.msk.bf16.vlgmr.msra.gmra.mrb[20].mxu1 %vm1307_vm2, %v700_v56 }
 0x1af   : > { %2779 = vmatmul.mubr.msk.bf16.vlgmr.msra.gmra.mrb[8].mxu0 %vm1307_vm2, %v701_v19  ;;  %2783 = vmatpush3.bf16.xpose.msra.mxu1 %v1634_v0  ;;  %v1301_v19 = vpack.c.bf16 %v3402_v15, %v3402_v15 }
 0x1b0   : > { %2789 = vmatpush3.bf16.msra.mxu0 %v1762_v63  ;;  %2784 = vmatprep.mubr.msk.bf16.mxu1 %vm3036_vm0, %v3035_v3 }
 0x1b1   : > { %2794 = vmatprep.subr.bf16.mxu1 %v3035_v3  ;;  %2790 = vmatprep.mubr.msk.bf16.mxu0 %vm3036_vm0, %v3035_v3 }
 0x1b2   : > { %2800 = vmatprep.subr.bf16.mxu0 %v3035_v3 }
 0x1b6   : > { %2785 = vmatmul.mubr.msk.bf16.vlgmr.msra.gmra.mrb[24].mxu1 %vm1307_vm2, %v702_v25  ;;  %v1854_v25 = vsel %vm1760_vm3, %v1301_v19, 0 }
 0x1b7   : > { %2795 = vmatpush3.bf16.msra.mxu1 %v1808_v26  ;;  %2796 = vmatprep.mubr.msk.bf16.mxu1 %vm3036_vm0, %v3035_v3 }
 0x1b8   : > { %2806 = vmatprep.subr.bf16.mxu1 %v3035_v3 }
 0x268   : > { %v1348_v27 = vpop.f32.mrb[8].mxu1 }
 0x269   : > { %v2744_v28 = vpop.f32.mrb[9].mxu1  ;;  %v1677_v30 = vsel %vm1676_vm4, %v1348_v27, -inf }
 0x26a   : > { %1678 = vmax.xlane.f32.xlu0 %v1677_v30  ;;  %v1351_v31 = vpop.f32.mrb[10].mxu1 }
 0x26b   : > { %v2745_v32 = vpop.f32.mrb[11].mxu1  ;;  %v1302_v31 = vpack.c.bf16 %v3404_v16, %v3404_v16 }
 0x26d   : > { %v1440_v33 = vpop.f32.mrb[0].mxu0 }
 0x26e   : > { %v2756_v34 = vpop.f32.mrb[1].mxu0  ;;  %v1683_v35 = vsel %vm1676_vm4, %v1440_v33, -inf }
 0x26f   : > { %v1443_v36 = vpop.f32.mrb[2].mxu0  ;;  %1684 = vmax.xlane.f32.xlu1 %v1683_v35 }
 0x270   : > { %v2757_v37 = vpop.f32.mrb[3].mxu0 }
 0x271   : > { %v1394_v38 = vpop.f32.mrb[12].mxu1 }
 0x272   : > { %v2750_v39 = vpop.f32.mrb[13].mxu1  ;;  %v1680_v42 = vsel %vm1676_vm4, %v1394_v38, -inf }
 0x273   : > { %1681 = vmax.xlane.f32.xlu1 %v1680_v42  ;;  %v1397_v20 = vpop.f32.mrb[14].mxu1  ;;  %v1900_v42 = vsel %vm1760_vm3, %v1302_v31, 0 }
 0x274   : > { %v2751_v21 = vpop.f32.mrb[15].mxu1 }
 0x279   : > { %v3432_v44 = vpop.f32.mrb[16].mxu1 }
 0x27a   : > { %v1532_v45 = vpop.f32.mrb[4].mxu0  ;;  %v2762_v40 = vpop.f32.mrb[17].mxu1  ;;  %v1686_v54 = vsel %vm1676_vm4, %v3432_v44, -inf }
 0x27b   : > { %v2768_v41 = vpop.f32.mrb[5].mxu0  ;;  %v1689_v46 = vsel %vm1676_vm4, %v1532_v45, -inf  ;;  %v1489_v47 = vpop.f32.mrb[18].mxu1 }
 0x27c   : > { %v1535_v48 = vpop.f32.mrb[6].mxu0  ;;  %1690 = vmax.xlane.f32.xlu0 %v1689_v46  ;;  %v2763_v49 = vpop.f32.mrb[19].mxu1 }
 0x27d   : > { %v2769_v53 = vpop.f32.mrb[7].mxu0 }
 0x280   : > { %1687 = vmax.xlane.f32.xlu0 %v1686_v54 }
 0x281   : > { %v3437_v57 = vpop.f32.mrb[20].mxu1 }
 0x282   : > { %v3439_v58 = vpop.f32.mrb[8].mxu0  ;;  %v2774_v59 = vpop.f32.mrb[21].mxu1  ;;  %v1692_v60 = vsel %vm1676_vm4, %v3437_v57, -inf }
 0x283   : > { %v2780_v61 = vpop.f32.mrb[9].mxu0  ;;  %1693 = vmax.xlane.f32.xlu1 %v1692_v60  ;;  %v1581_v62 = vpop.f32.mrb[22].mxu1  ;;  %v1695_v9 = vsel %vm1676_vm4, %v3439_v58, -inf }
 0x284   : > { %v1627_v1 = vpop.f32.mrb[10].mxu0  ;;  %v2775_v5 = vpop.f32.mrb[23].mxu1 }
 0x285   : > { %v2781_v6 = vpop.f32.mrb[11].mxu0 }
 0x289   : > { %v3443_v7 = vpop.f32.mrb[24].mxu1 }
 0x28a   : > { %v2786_v8 = vpop.f32.mrb[25].mxu1  ;;  %v1698_v10 = vsel %vm1676_vm4, %v3443_v7, -inf }
 0x28b   : > { %v1673_v2 = vpop.f32.mrb[26].mxu1 }
 0x28c   : > { %v2787_v4 = vpop.f32.mrb[27].mxu1 }
 0x294   : > { %1021 = vrot.lane.b32.xlu1 %v3196_v29, %s3044_s27 }
 0x296   : > { %1024 = vrot.lane.b32.xlu0 %v3196_v29, %s3043_s20 }
 0x2b5   : > { %1699 = vmax.xlane.f32.xlu0 %v1698_v10 }
 0x2b8   : > { %1696 = vmax.xlane.f32.xlu1 %v1695_v9 }
 0x2f7   : > { %v1679_v13 = vpop.xlane.xlu0 %1678 }
 0x2f8   : > { %v1701_v14 = vsub.f32 %v1348_v27, %v1679_v13 }
 0x2fa   : > { %v1709_v17 = vmul.f32 1.442695, %v1701_v14 }
 0x2fc   : > { %v1685_v18 = vpop.xlane.xlu1 %1684  ;;  %2923 = vpow2.f32 %v1709_v17 }
 0x2fd   : > { %v1703_v51 = vsub.f32 %v1440_v33, %v1685_v18 }
 0x2ff   : > { %v1713_v52 = vmul.f32 1.442695, %v1703_v51 }
 0x300   : > { %v1682_v55 = vpop.xlane.xlu1 %1681 }
 0x301   : > { %2925 = vpow2.f32 %v1713_v52  ;;  %v1702_v29 = vsub.f32 %v1394_v38, %v1682_v55 }
 0x303   : > { %v1711_v56 = vmul.f32 1.442695, %v1702_v29 }
 0x305   : > { %2927 = vpow2.f32 %v1711_v56 }
 0x306   : > { %v2924_v63 = vpop.eup %2923 }
 0x307   : > { %v1725_v0 = vsel %vm1676_vm4, %v2924_v63, 0.0  ;;  %v1749_v22 = vpack.c.bf16 %v2924_v63, %v2924_v63 }
 0x308   : > { %1726 = vadd.xlane.f32.xlu0 %v1725_v0 }
 0x309   : > { %v1691_v23 = vpop.xlane.xlu0 %1690  ;;  %2791 = vmatmul.mubr.msk.bf16.vlgmr.msra.gmra.mrb[12].mxu0 %vm1676_vm4, %v1749_v22 }
 0x30a   : > { %v1705_v24 = vsub.f32 %v1532_v45, %v1691_v23  ;;  %2801 = vmatpush3.bf16.msra.mxu0 %v1854_v25  ;;  %2802 = vmatprep.mubr.msk.bf16.mxu0 %vm3036_vm0, %v3035_v3 }
 0x30b   : > { %v2926_v26 = vpop.eup %2925  ;;  %2812 = vmatprep.subr.bf16.mxu0 %v3035_v3 }
 0x30c   : > { %v1717_v27 = vmul.f32 1.442695, %v1705_v24  ;;  %v1731_v28 = vsel %vm1676_vm4, %v2926_v26, 0.0  ;;  %v1751_v37 = vpack.c.bf16 %v2926_v26, %v2926_v26 }
 0x30d   : > { %v1688_v15 = vpop.xlane.xlu0 %1687  ;;  %1732 = vadd.xlane.f32.xlu0 %v1731_v28 }
 0x30e   : > { %2929 = vpow2.f32 %v1717_v27  ;;  %v1704_v30 = vsub.f32 %v3432_v44, %v1688_v15 }
 0x30f   : > { %v2928_v32 = vpop.eup %2927 }
 0x310   : > { %v1715_v33 = vmul.f32 1.442695, %v1704_v30  ;;  %v1694_v34 = vpop.xlane.xlu1 %1693  ;;  %v1728_v35 = vsel %vm1676_vm4, %v2928_v32, 0.0  ;;  %v1750_v36 = vpack.c.bf16 %v2928_v32, %v2928_v32 }
 0x311   : > { %v1025_v38 = vpop.permute.xlu0 %1024  ;;  %v1706_v39 = vsub.f32 %v3437_v57, %v1694_v34  ;;  %1729 = vadd.xlane.f32.xlu1 %v1728_v35  ;;  %2803 = vmatmul.mubr.msk.bf16.vlgmr.msra.gmra.mrb[16].mxu0 %vm1676_vm4, %v1751_v37 }
 0x312   : > { %2931 = vpow2.f32 %v1715_v33  ;;  %2797 = vmatmul.mubr.msk.bf16.vlgmr.msra.gmra.mrb[28].mxu1 %vm1676_vm4, %v1750_v36  ;;  %v1075_v20 = vcombine.low %v1019_v12, %v1025_v38  ;;  %v1076_v16 = vcombine.high %v1019_v12, %v1025_v38  ;;  %2814 = vmatprep.mubr.msk.bf16.mxu0 %vm3036_vm0, %v3035_v3 }
 0x313   : > { %v1719_v21 = vmul.f32 1.442695, %v1706_v39  ;;  %2807 = vmatpush3.bf16.msra.mxu1 %v1900_v42  ;;  %2808 = vmatprep.mubr.msk.bf16.mxu1 %vm3036_vm0, %v3035_v3 }
 0x314   : > { %v1022_v44 = vpop.permute.xlu1 %1021  ;;  %2818 = vmatprep.subr.bf16.mxu1 %v3035_v3  ;;  %v1083_v41 = vrot.slane %v1075_v20, %v3229_v43  ;;  %v1090_v46 = vrot.slane %v1076_v16, %v3229_v43 }
 0x315   : > { %2933 = vpow2.f32 %v1719_v21  ;;  %v1059_v45 = vcombine.low %v1016_v11, %v1022_v44  ;;  %v1060_v40 = vcombine.high %v1016_v11, %v1022_v44 }
 0x317   : > { %v1067_v47 = vrot.slane %v1059_v45, %v3229_v43  ;;  %v1074_v48 = vrot.slane %v1060_v40, %v3229_v43 }
 0x318   : > { %v2930_v49 = vpop.eup %2929 }
 0x319   : > { %v1123_v53 = vcombine.low %v1067_v47, %v1083_v41  ;;  %v1124_v54 = vcombine.high %v1067_v47, %v1083_v41  ;;  %v1139_v57 = vcombine.low %v1074_v48, %v1090_v46  ;;  %v1140_v59 = vcombine.high %v1074_v48, %v1090_v46 }
 0x31a   : > { %v1737_v60 = vsel %vm1676_vm4, %v2930_v49, 0.0  ;;  %v1753_v33 = vpack.c.bf16 %v2930_v49, %v2930_v49 }
 0x31b   : > { %v1131_v61 = vrot.slane %v1123_v53, %v3231_v50  ;;  %v1138_v62 = vrot.slane %v1124_v54, %v3231_v50  ;;  %v1147_v1 = vrot.slane %v1139_v57, %v3231_v50  ;;  %v1154_v5 = vrot.slane %v1140_v59, %v3231_v50  ;;  %1738 = vadd.xlane.f32.xlu0 %v1737_v60 }
 0x31c   : > { %v2932_v6 = vpop.eup %2931 }
 0x31d   : > { %v2652_v8 = vcombine.low %v1131_v61, %v1138_v62  ;;  %v2654_v2 = vcombine.high %v1131_v61, %v1138_v62  ;;  %v2656_v4 = vcombine.low %v1147_v1, %v1154_v5  ;;  %v2658_v10 = vcombine.high %v1147_v1, %v1154_v5 }
 0x31e   : > { %v1734_v9 = vsel %vm1676_vm4, %v2932_v6, 0.0  ;;  %v1752_v11 = vpack.c.bf16 %v2932_v6, %v2932_v6 }
 0x31f   : > { %v2934_v12 = vpop.eup %2933  ;;  %v1178_v13 = vrot.slane %v2652_v8, %v3229_v43  ;;  %v1194_v14 = vrot.slane %v2654_v2, %v3229_v43  ;;  %v1210_v17 = vrot.slane %v2656_v4, %v3229_v43  ;;  %v1226_v18 = vrot.slane %v2658_v10, %v3229_v43  ;;  %1735 = vadd.xlane.f32.xlu1 %v1734_v9 }
 0x320   : > { %2809 = vmatmul.mubr.msk.bf16.vlgmr.msra.gmra.mrb[32].mxu1 %vm1676_vm4, %v1752_v11  ;;  %v1740_v51 = vsel %vm1676_vm4, %v2934_v12, 0.0  ;;  %v1754_v34 = vpack.c.bf16 %v2934_v12, %v2934_v12 }
 0x321   : > { %v1243_v52 = vcombine.low %v1178_v13, %v1194_v14  ;;  %v1275_v55 = vcombine.low %v1210_v17, %v1226_v18  ;;  %2820 = vmatprep.mubr.msk.bf16.mxu1 %vm3036_vm0, %v3035_v3  ;;  %v1244_v29 = vcombine.high %v1178_v13, %v1194_v14  ;;  %v1276_v56 = vcombine.high %v1210_v17, %v1226_v18 }
 0x323   : > { %1741 = vadd.xlane.f32.xlu1 %v1740_v51  ;;  %v1251_v19 = vrot.slane %v1243_v52, %v3231_v50  ;;  %v1283_v63 = vrot.slane %v1275_v55, %v3231_v50  ;;  %v1258_v0 = vrot.slane %v1244_v29, %v3231_v50  ;;  %v1290_v22 = vrot.slane %v1276_v56, %v3231_v50 }
 0x325   : > { %v1295_v23 = vcombine.low %v1251_v19, %v1283_v63  ;;  %v1296_v24 = vcombine.high %v1251_v19, %v1283_v63  ;;  %v1297_v25 = vcombine.low %v1258_v0, %v1290_v22  ;;  %v1298_v26 = vcombine.high %v1258_v0, %v1290_v22 }
 0x327   : > { %v1303_v27 = vpack.c.bf16 %v1295_v23, %v1295_v23  ;;  %v1304_v28 = vpack.c.bf16 %v1296_v24, %v1296_v24  ;;  %v1305_v31 = vpack.c.bf16 %v1297_v25, %v1297_v25  ;;  %v1306_v32 = vpack.c.bf16 %v1298_v26, %v1298_v26 }
 0x329   : > { %v1946_v15 = vsel %vm1760_vm3, %v1303_v27, 0  ;;  %v1992_v30 = vsel %vm1760_vm3, %v1304_v28, 0  ;;  %v2038_v35 = vsel %vm1760_vm3, %v1305_v31, 0  ;;  %v2084_v36 = vsel %vm1760_vm3, %v1306_v32, 0 }
 0x32a   : > { %2813 = vmatpush3.bf16.msra.mxu0 %v1946_v15  ;;  %2819 = vmatpush3.bf16.msra.mxu1 %v1992_v30 }
 0x32b   : > { %2824 = vmatprep.subr.bf16.mxu0 %v3035_v3  ;;  %2830 = vmatprep.subr.bf16.mxu1 %v3035_v3 }
 0x32d   : > { %2815 = vmatmul.mubr.msk.bf16.vlgmr.msra.gmra.mrb[20].mxu0 %vm1676_vm4, %v1753_v33  ;;  %2821 = vmatmul.mubr.msk.bf16.vlgmr.msra.gmra.mrb[36].mxu1 %vm1676_vm4, %v1754_v34 }
 0x32e   : > { %2825 = vmatpush3.bf16.msra.mxu0 %v2038_v35  ;;  %2831 = vmatpush3.bf16.msra.mxu1 %v2084_v36  ;;  %v2455_v36 = vld [vmem:[%s3691_s4] sm:$0xff] }
 0x32f   : > { %2832 = vmatprep.mubr.msk.bf16.mxu1 %vm3036_vm0, %v3035_v3  ;;  %2826 = vmatprep.mubr.msk.bf16.mxu0 %vm3036_vm0, %v3035_v3 }
 0x330   : > { %2836 = vmatprep.subr.bf16.mxu0 %v3035_v3 }
 0x342   : > { %v1700_v37 = vpop.xlane.xlu0 %1699 }
 0x343   : > { %v1708_v38 = vsub.f32 %v3443_v7, %v1700_v37  ;;  %v2456_v37 = vld [vmem:[%s3691_s4 + $0x8] sm:$0xff] }
 0x345   : > { %v1723_v39 = vmul.f32 1.442695, %v1708_v38  ;;  %v1697_v42 = vpop.xlane.xlu1 %1696 }
 0x346   : > { %v1707_v20 = vsub.f32 %v3439_v58, %v1697_v42 }
 0x347   : > { %2935 = vpow2.f32 %v1723_v39 }
 0x348   : > { %v1721_v16 = vmul.f32 1.442695, %v1707_v20 }
 0x34a   : > { %2937 = vpow2.f32 %v1721_v16 }
 0x351   : > { %v2936_v21 = vpop.eup %2935 }
 0x352   : > { %v1746_v44 = vsel %vm1676_vm4, %v2936_v21, 0.0  ;;  %v1756_v45 = vpack.c.bf16 %v2936_v21, %v2936_v21 }
 0x353   : > { %1747 = vadd.xlane.f32.xlu1 %v1746_v44  ;;  %v2457_v44 = vld [vmem:[%s3691_s4 + $0x10] sm:$0xff] }
 0x354   : > { %v2938_v40 = vpop.eup %2937  ;;  %2833 = vmatmul.mubr.msk.bf16.vlgmr.msra.gmra.mrb[40].mxu1 %vm1676_vm4, %v1756_v45  ;;  %v2458_v45 = vld [vmem:[%s3691_s4 + $0x18] sm:$0xff] }
 0x355   : > { %v1743_v41 = vsel %vm1676_vm4, %v2938_v40, 0.0  ;;  %v1755_v46 = vpack.c.bf16 %v2938_v40, %v2938_v40 }
 0x356   : > { %1744 = vadd.xlane.f32.xlu0 %v1743_v41 }
 0x357   : > { %2827 = vmatmul.mubr.msk.bf16.vlgmr.msra.gmra.mrb[24].mxu0 %vm1676_vm4, %v1755_v46  ;;  %v2471_v46 = vpack.c.bf16 %v2456_v37, %v2455_v36 }
 0x358   : > { %2852 = vmatprep.mubr.msk.bf16.mxu0 %vm3036_vm0, %v3035_v3 }
 0x359   : > { %2837 = vmatpush3.bf16.msra.mxu0 %v2471_v46 }
 0x35a   : > { %2838 = vmatprep.subr.bf16.mxu0 %v3035_v3 }
 0x395   : > { %v1727_v58 = vpop.xlane.xlu0 %1726 }
 0x396   : > { %2939 = vrcp.f32 %v1727_v58 }
 0x39a   : > { %v1733_v7 = vpop.xlane.xlu0 %1732 }
 0x39b   : > { %2941 = vrcp.f32 %v1733_v7 }
 0x39e   : > { %v1730_v53 = vpop.xlane.xlu1 %1729 }
 0x39f   : > { %2943 = vrcp.f32 %v1730_v53 }
 0x3a0   : > { %v2940_v57 = vpop.eup %2939 }
 0x3a5   : > { %v2942_v60 = vpop.eup %2941 }
 0x3a9   : > { %v2944_v13 = vpop.eup %2943 }
 0x3ac   : > { %v1736_v59 = vpop.xlane.xlu1 %1735 }
 0x3ad   : > { %2945 = vrcp.f32 %v1736_v59  ;;  %v2472_v59 = vpack.c.bf16 %v2458_v45, %v2457_v44 }
 0x3af   : > { %2839 = vmatpush3.bf16.msra.mxu0 %v2472_v59 }
 0x3b0   : > { %2840 = vmatprep.subr.bf16.mxu0 %v3035_v3 }
 0x3b7   : > { %v2946_v14 = vpop.eup %2945 }
 0x3dc   : > { %v1798_v47 = vpop.f32.mrb[12].mxu0 }
 0x3dd   : > { %v2792_v48 = vpop.f32.mrb[13].mxu0  ;;  %v2134_v1 = vmul.f32 %v2940_v57, %v1798_v47 }
 0x3de   : > { %v1801_v49 = vpop.f32.mrb[14].mxu0 }
 0x3df   : > { %v2793_v54 = vpop.f32.mrb[15].mxu0 }
 0x3e4   : > { %v1890_v62 = vpop.f32.mrb[16].mxu0 }
 0x3e5   : > { %v1844_v61 = vpop.f32.mrb[28].mxu1  ;;  %v2136_v5 = vmul.f32 %v2942_v60, %v1890_v62  ;;  %v2804_v8 = vpop.f32.mrb[17].mxu0 }
 0x3e6   : > { %v2798_v6 = vpop.f32.mrb[29].mxu1  ;;  %v1893_v4 = vpop.f32.mrb[18].mxu0  ;;  %v2135_v18 = vmul.f32 %v2944_v13, %v1844_v61 }
 0x3e7   : > { %v1847_v2 = vpop.f32.mrb[30].mxu1  ;;  %v2142_v10 = vcombine.low %v2134_v1, %v2136_v5  ;;  %v2143_v9 = vcombine.high %v2134_v1, %v2136_v5  ;;  %v2805_v12 = vpop.f32.mrb[19].mxu0  ;;  %v2459_v5 = vld [vmem:[%s3691_s4 + $0x20] sm:$0xff]  ;;  %v2460_v6 = vld [vmem:[%s3691_s4 + $0x28] sm:$0xff] }
 0x3e8   : > { %v2799_v11 = vpop.f32.mrb[31].mxu1  ;;  %v2462_v12 = vld [vmem:[%s3691_s4 + $0x38] sm:$0xff] }
 0x3e9   : > { %v2150_v63 = vrot.slane %v2142_v10, %v3229_v43  ;;  %v2157_v0 = vrot.slane %v2143_v9, %v3229_v43  ;;  %v2473_v9 = vpack.c.bf16 %v2460_v6, %v2459_v5  ;;  %v2461_v11 = vld [vmem:[%s3691_s4 + $0x30] sm:$0xff] }
 0x3ea   : > { %v2474_v13 = vpack.c.bf16 %v2462_v12, %v2461_v11 }
 0x3eb   : > { %2841 = vmatpush3.bf16.msra.mxu0 %v2473_v9  ;;  %v2470_v9 = vld [vmem:[%s3691_s4 + $0x78] sm:$0xff] }
 0x3ec   : > { %2842 = vmatprep.subr.bf16.mxu0 %v3035_v3 }
 0x3ef   : > { %2843 = vmatpush3.bf16.msra.mxu0 %v2474_v13 }
 0x3f0   : > { %2844 = vmatprep.subr.bf16.mxu0 %v3035_v3 }
 0x3f3   : > { %v1936_v17 = vpop.f32.mrb[32].mxu1 }
 0x3f4   : > { %v2137_v51 = vmul.f32 %v2946_v14, %v1936_v17  ;;  %v2810_v52 = vpop.f32.mrb[33].mxu1  ;;  %v2463_v14 = vld [vmem:[%s3691_s4 + $0x40] sm:$0xff]  ;;  %v2464_v17 = vld [vmem:[%s3691_s4 + $0x48] sm:$0xff] }
 0x3f5   : > { %v1939_v55 = vpop.f32.mrb[34].mxu1  ;;  %v2466_v52 = vld [vmem:[%s3691_s4 + $0x58] sm:$0xff] }
 0x3f6   : > { %v2158_v29 = vcombine.low %v2135_v18, %v2137_v51  ;;  %v2159_v56 = vcombine.high %v2135_v18, %v2137_v51  ;;  %v2811_v19 = vpop.f32.mrb[35].mxu1  ;;  %v2475_v18 = vpack.c.bf16 %v2464_v17, %v2463_v14  ;;  %v2465_v51 = vld [vmem:[%s3691_s4 + $0x50] sm:$0xff] }
 0x3f7   : > { %v2476_v55 = vpack.c.bf16 %v2466_v52, %v2465_v51 }
 0x3f8   : > { %v2166_v22 = vrot.slane %v2158_v29, %v3229_v43  ;;  %v2173_v23 = vrot.slane %v2159_v56, %v3229_v43  ;;  %2845 = vmatpush3.bf16.msra.mxu0 %v2475_v18  ;;  %v1742_v29 = vpop.xlane.xlu1 %1741  ;;  %v1739_v56 = vpop.xlane.xlu0 %1738 }
 0x3f9   : > { %2846 = vmatprep.subr.bf16.mxu0 %v3035_v3  ;;  %2947 = vrcp.f32 %v1742_v29 }
 0x3fa   : > { %v2206_v24 = vcombine.low %v2150_v63, %v2166_v22  ;;  %v2207_v25 = vcombine.high %v2150_v63, %v2166_v22  ;;  %v2222_v26 = vcombine.low %v2157_v0, %v2173_v23  ;;  %v2223_v27 = vcombine.high %v2157_v0, %v2173_v23 }
 0x3fc   : > { %v2214_v28 = vrot.slane %v2206_v24, %v3231_v50  ;;  %v2221_v15 = vrot.slane %v2207_v25, %v3231_v50  ;;  %v2230_v30 = vrot.slane %v2222_v26, %v3231_v50  ;;  %v2237_v31 = vrot.slane %v2223_v27, %v3231_v50  ;;  %2847 = vmatpush3.bf16.msra.mxu0 %v2476_v55  ;;  %v1748_v19 = vpop.xlane.xlu1 %1747  ;;  %v1745_v63 = vpop.xlane.xlu0 %1744 }
 0x3fd   : > { %2848 = vmatprep.subr.bf16.mxu0 %v3035_v3  ;;  %2949 = vrcp.f32 %v1748_v19 }
 0x3fe   : > { %v2675_v32 = vcombine.low %v2214_v28, %v2221_v15  ;;  %v2677_v33 = vcombine.high %v2214_v28, %v2221_v15  ;;  %v2679_v34 = vcombine.low %v2230_v30, %v2237_v31  ;;  %v2681_v35 = vcombine.high %v2230_v30, %v2237_v31 }
 0x3ff   : > { %2951 = vrcp.f32 %v1739_v56 }
 0x400   : > { %v3532_v38 = vpop.f32.mrb[20].mxu0  ;;  %v3534_v39 = vpop.f32.mrb[36].mxu1  ;;  %v2286_v42 = vrot.slane %v2675_v32, %v3229_v43  ;;  %v2302_v20 = vrot.slane %v2677_v33, %v3229_v43  ;;  %v2318_v16 = vrot.slane %v2679_v34, %v3229_v43  ;;  %v2334_v21 = vrot.slane %v2681_v35, %v3229_v43 }
 0x401   : > { %v2816_v40 = vpop.f32.mrb[21].mxu0  ;;  %v2822_v41 = vpop.f32.mrb[37].mxu1  ;;  %2953 = vrcp.f32 %v1745_v63 }
 0x402   : > { %v1985_v58 = vpop.f32.mrb[22].mxu0  ;;  %v2343_v7 = vcombine.high %v2286_v42, %v2302_v20  ;;  %v2375_v47 = vcombine.high %v2318_v16, %v2334_v21  ;;  %v2342_v48 = vcombine.low %v2286_v42, %v2302_v20  ;;  %v2374_v49 = vcombine.low %v2318_v16, %v2334_v21  ;;  %v2031_v53 = vpop.f32.mrb[38].mxu1 }
 0x403   : > { %v2817_v54 = vpop.f32.mrb[23].mxu0  ;;  %v2823_v57 = vpop.f32.mrb[39].mxu1 }
 0x404   : > { %v2357_v60 = vrot.slane %v2343_v7, %v3231_v50  ;;  %v2389_v61 = vrot.slane %v2375_v47, %v3231_v50  ;;  %v3549_v62 = vrot.slane %v2342_v48, %v3231_v50  ;;  %v3552_v1 = vrot.slane %v2374_v49, %v3231_v50  ;;  %v2948_v0 = vpop.eup %2947  ;;  %v2468_v7 = vld [vmem:[%s3691_s4 + $0x68] sm:$0xff] }
 0x405   : > { %v2139_v24 = vmul.f32 %v2948_v0, %v3534_v39 }
 0x406   : > { %v2408_v8 = vcombine.low %v2357_v60, %v2389_v61  ;;  %v2407_v2 = vcombine.high %v3549_v62, %v3552_v1  ;;  %v2409_v4 = vcombine.high %v2357_v60, %v2389_v61  ;;  %v2406_v10 = vcombine.low %v3549_v62, %v3552_v1 }
 0x407   : > { %v2950_v22 = vpop.eup %2949 }
 0x408   : > { %2419 = vrot.lane.b32.xlu1 %v2408_v8, %s3044_s27  ;;  %2415 = vrot.lane.b32.xlu0 %v2407_v2, %s3043_s20  ;;  %s3639_s27 = scalar_lea.hbm %s3693_s6, %s2685_s15 }
 0x409   : > { %v2952_v27 = vpop.eup %2951 }
 0x40a   : > { %v2138_v34 = vmul.f32 %v2952_v27, %v3532_v38  ;;  %v2467_v38 = vld [vmem:[%s3691_s4 + $0x60] sm:$0xff] }
 0x40b   : > { %v2954_v15 = vpop.eup %2953  ;;  %v2477_v54 = vpack.c.bf16 %v2468_v7, %v2467_v38 }
 0x40c   : > { %2423 = vrot.lane.b32.xlu1 %v2409_v4, %s3041_s18  ;;  %v2469_v4 = vld [vmem:[%s3691_s4 + $0x70] sm:$0xff] }
 0x40d   : > { %2849 = vmatpush3.bf16.msra.mxu0 %v2477_v54  ;;  %v2478_v17 = vpack.c.bf16 %v2470_v9, %v2469_v4 }
 0x40e   : > { %2850 = vmatprep.subr.bf16.mxu0 %v3035_v3 }
 0x411   : > { %2851 = vmatpush3.bf16.msra.mxu0 %v2478_v17 }
 0x427   : > { %v2120_v23 = vpop.f32.mrb[40].mxu1 }
 0x428   : > { %v2141_v25 = vmul.f32 %v2950_v22, %v2120_v23  ;;  %v2834_v26 = vpop.f32.mrb[41].mxu1 }
 0x429   : > { %v2123_v28 = vpop.f32.mrb[42].mxu1 }
 0x42a   : > { %v2190_v30 = vcombine.low %v2139_v24, %v2141_v25  ;;  %v2191_v31 = vcombine.high %v2139_v24, %v2141_v25  ;;  %v2835_v32 = vpop.f32.mrb[43].mxu1  ;;  %v2074_v33 = vpop.f32.mrb[24].mxu0 }
 0x42b   : > { %v2140_v35 = vmul.f32 %v2954_v15, %v2074_v33  ;;  %v2828_v36 = vpop.f32.mrb[25].mxu0 }
 0x42c   : > { %v2077_v37 = vpop.f32.mrb[26].mxu0  ;;  %v2198_v21 = vrot.slane %v2190_v30, %v3229_v43  ;;  %v2205_v39 = vrot.slane %v2191_v31, %v3229_v43  ;;  %v2683_v30 = vld [vmem:[%s3692_s5] ss:$0 sm:$0xff] }
 0x42d   : > { %v2174_v42 = vcombine.low %v2138_v34, %v2140_v35  ;;  %v2175_v20 = vcombine.high %v2138_v34, %v2140_v35  ;;  %v2829_v16 = vpop.f32.mrb[27].mxu0 }
 0x42f   : > { %v2182_v44 = vrot.slane %v2174_v42, %v3229_v43  ;;  %v2189_v45 = vrot.slane %v2175_v20, %v3229_v43 }
 0x431   : > { %v2238_v40 = vcombine.low %v2182_v44, %v2198_v21  ;;  %v2239_v41 = vcombine.high %v2182_v44, %v2198_v21  ;;  %v2254_v46 = vcombine.low %v2189_v45, %v2205_v39  ;;  %v2255_v58 = vcombine.high %v2189_v45, %v2205_v39 }
 0x433   : > { %v2246_v47 = vrot.slane %v2238_v40, %v3231_v50  ;;  %v2253_v48 = vrot.slane %v2239_v41, %v3231_v50  ;;  %v2262_v49 = vrot.slane %v2254_v46, %v3231_v50  ;;  %v2269_v53 = vrot.slane %v2255_v58, %v3231_v50 }
 0x435   : > { %v2676_v57 = vcombine.low %v2246_v47, %v2253_v48  ;;  %v2678_v59 = vcombine.high %v2246_v47, %v2253_v48  ;;  %v2680_v60 = vcombine.low %v2262_v49, %v2269_v53  ;;  %v2682_v61 = vcombine.high %v2262_v49, %v2269_v53 }
 0x437   : > { %v2293_v5 = vrot.slane %v2676_v57, %v3229_v43  ;;  %v2309_v6 = vrot.slane %v2678_v59, %v3229_v43  ;;  %v2325_v8 = vrot.slane %v2680_v60, %v3229_v43  ;;  %v2341_v2 = vrot.slane %v2682_v61, %v3229_v43 }
 0x439   : > { %v2358_v11 = vcombine.low %v2293_v5, %v2309_v6  ;;  %v2390_v12 = vcombine.low %v2325_v8, %v2341_v2  ;;  %v2359_v13 = vcombine.high %v2293_v5, %v2309_v6  ;;  %v2391_v14 = vcombine.high %v2325_v8, %v2341_v2 }
 0x43b   : > { %v2366_v18 = vrot.slane %v2358_v11, %v3231_v50  ;;  %v2398_v51 = vrot.slane %v2390_v12, %v3231_v50  ;;  %v2373_v43 = vrot.slane %v2359_v13, %v3231_v50  ;;  %v2405_v3 = vrot.slane %v2391_v14, %v3231_v50 }
 0x43d   : > { %v2411_v52 = vcombine.high %v2366_v18, %v2398_v51  ;;  %v2410_v55 = vcombine.low %v2366_v18, %v2398_v51  ;;  %v2413_v29 = vcombine.high %v2373_v43, %v2405_v3  ;;  %v2412_v56 = vcombine.low %v2373_v43, %v2405_v3 }
 0x43f   : > { %2431 = vrot.lane.b32.xlu1 %v2411_v52, %s3038_s8  ;;  %2427 = vrot.lane.b32.xlu0 %v2410_v55, %s3042_s19  ;;  %s275_s8 = sand.u32 1, %s3017_s22  }
 0x440   : > { %s2528_s24 = scalar_lea.sflag [#allocation3], %s275_s8 }
 0x443   : > { %2439 = vrot.lane.b32.xlu1 %v2413_v29, %s3039_s16  ;;  %2435 = vrot.lane.b32.xlu0 %v2412_v56, %s3040_s17  ;;  %s2630_s16 = sshll.u32 %s275_s8, 3 }
 0x444   : > { %s277_s18 = scalar_lea.vmem [#allocation2], %s2630_s16 }
 0x445   : > { %s2542_s28 = sshll.u32 %s277_s18, 4  ;;  %s3641_s28 = int_to_ptr.vmem [resolvable:$true] %s2542_s28 }
 0x446   : > { %s2955_s20 = scalar_lea.vmem %s3641_s28, 128  ;;  %p2962_p1 = scmp.lt.s32.totalorder %s3641_s28, %s2960_s13 }
 0x447   : > { %p2956_p12 = scmp.ne.s32.totalorder %s3641_s28, %s2955_s20  ;;  %p2963_p2 = scmp.lt.s32.totalorder %s2961_s14, %s2955_s20 }
 0x449   : > { %p2957_p13 = pnand %p2956_p12, %p3123_p4  ;;  %p2964_p3 = por %p2963_p2, %p2962_p1 }
 0x44b   : > { %p2958_p0 = pneg %p2957_p13 }
 0x44d   : > { %p2965_p5 = pnand %p2964_p3, %p2958_p0 }
 0x47a   : > { %v2420_v19 = vpop.permute.xlu1 %2419  ;;  %v2416_v63 = vpop.permute.xlu0 %2415 }
 0x47b   : > { %v2442_v50 = vsel %vm1307_vm2, %v2406_v10, %v2416_v63 }
 0x47c   : > { %v2443_v22 = vsel %vm300_vm1, %v2442_v50, %v2420_v19 }
 0x47e   : > { %v2424_v0 = vpop.permute.xlu1 %2423 }
 0x47f   : > { %v2445_v23 = vsel %vm2444_vm5, %v2443_v22, %v2424_v0 }
 0x4b1   : > { %v2432_v24 = vpop.permute.xlu1 %2431  ;;  %v2428_v25 = vpop.permute.xlu0 %2427 }
 0x4b2   : > { %v2447_v26 = vsel %vm2446_vm6, %v2445_v23, %v2428_v25 }
 0x4b3   : > { %v2449_v28 = vsel %vm2448_vm7, %v2447_v26, %v2432_v24 }
 0x4b5   : > { %v2440_v27 = vpop.permute.xlu1 %2439  ;;  %v2436_v15 = vpop.permute.xlu0 %2435 }
 0x4b6   : > { %v2451_v62 = vsel %vm2450_vm8, %v2449_v28, %v2436_v15 }
 0x4b7   : > { %v2453_v1 = vsel %vm2452_vm9, %v2451_v62, %v2440_v27 }
 0x4b8   : > { %v2454_v10 = vpack.c.bf16 %v2453_v1, %v2453_v1 }
 0x4ba   : > { %2853 = vmatmul.mubr.bf16.vlgmr.msra.gmra.mrb[28].mxu0 %v2454_v10 }
 0x58d   : > { %v2520_v31 = vpop.f32.mrb[28].mxu0 }
 0x58e   : > { %v2521_v32 = vadd.f32 %v2683_v30, %v2520_v31  ;;  %v2854_v33 = vpop.f32.mrb[29].mxu0 }
 0x58f   : > { %v2523_v34 = vpop.f32.mrb[30].mxu0 }
 0x590   : > { %v2855_v35 = vpop.f32.mrb[31].mxu0  ;;  %2526 = vst.msk [vmem:[%s277_s18] sm:$0xff] %vm300_vm1, %v2521_v32 }
 0x591   : > { %2968 = shalt.err (!%p2965_p5)
}
 0x592   : > { %s2969_s8 = scalar_lea.hbm %s3639_s27, 128  ;;  %s2973_s19 = scalar_lea.hbm %s3693_s6, 256 }
 0x593   : > { %p2970_p6 = scmp.ne.s32.totalorder %s3639_s27, %s2969_s8  ;;  %p2974_p10 = scmp.lt.u32.totalorder %s3639_s27, %s3693_s6 }
 0x594   : > { %p2975_p11 = scmp.lt.u32.totalorder %s2973_s19, %s2969_s8  ;;  %p2977_p13 = scmp.lt.u32.totalorder %s2969_s8, %s3639_s27 }
 0x595   : > { %p2971_p7 = pnand %p2970_p6, %p3123_p4 }
 0x596   : > { %p2976_p12 = por %p2975_p11, %p2974_p10 }
 0x597   : > { %p2972_p9 = pneg %p2971_p7 }
 0x598   : > { %p2978_p0 = por %p2977_p13, %p2976_p12 }
 0x59a   : > { %p2979_p1 = pnand %p2978_p0, %p2972_p9 }
 0x59c   : > { %2982 = shalt.err (!%p2979_p1)
}
 0x59d   : > { %2856 = dma.vmem_to_hbm [thread:$0]  (%p3123_p4), %s3641_s28, 128, %s3639_s27, %s2528_s24  }
 0x59e PF: > { %p2862_p2 = scmp.ge.s32.totalorder %s3033_s26, 2  ;;  %s2554_s30 = sand.u32 1, %s3013_s21  }
 0x59f   : > { %s2555_s11 = scalar_lea.sflag [#allocation3], %s2554_s30 }
 0x5a0   : > { %p2859_p3 = pnand %p2862_p2, %p3130_p8 }
 0x5a2   : > { %3008 = dma.done.wait (!%p2859_p3), %s2555_s11, 128  }
 0x5a3   : > { %3010 = vsyncadd (!%p2859_p3), %s2555_s11, 4294967168  ;;  %s19_s26 = sadd.s32 1, %s3033_s26   ;;  %s3696_s21 = smov %s3017_s22 }
 0x5a4   : > { %p16_p5 = scmp.ge.s32.totalorder %s19_s26, 4   ;;  %s3697_s22 = smov %s3021_s23 }
 0x5a5   : > { %s3698_s23 = smov %s3136_s10  ;;  %s3699_s24 = smov %s3029_s25 }
 0x5a6   : > { %s3700_s25 = smov %s3702_s29  ;;  %18 = sbr.rel (!%p16_p5) target bundleno = 4 (0x4), region = 82 }
 0x5ad   :  { %2560 = vsyncpa [#allocation3], 1 }
 0x5ae   :  { %2562 = vsyncpa [#allocation3 + $0x1], 1 }

</bundles_post_ra>
